<compile_context>
chip_gen: v5e
topology: v5e:2x2
jax: 0.10.0
libtpu: 0.0.40
codegen_flags: <defaults>
</compile_context>

<pallas_src>
import jax
import jax.numpy as jnp
from jax.experimental import pallas as pl
from jax.experimental.pallas import tpu as pltpu


# ----------------------------------------------------------------------------
# Parameter / buffer setup (glue, plain JAX — runs once at module init time).
# ----------------------------------------------------------------------------
def build_pe(max_seq_len: int, input_size: int, dtype=jnp.float32) -> jnp.ndarray:
    """pe[pos, i]   = sin(pos / 10000**(2*i/input_size))
       pe[pos, i+1] = cos(pos / 10000**(2*i/input_size))   for i in 0,2,4,...
       Returns shape (1, max_seq_len, input_size)."""
    if input_size % 2 != 0:
        raise ValueError("input_size must be even (pairs of sin/cos columns).")
    pos = jnp.arange(max_seq_len, dtype=jnp.float32)[:, None]            # (L, 1)
    i = jnp.arange(0, input_size, 2, dtype=jnp.float32)[None, :]         # (1, D/2)
    denom = jnp.power(jnp.float32(10000.0), 2.0 * i / jnp.float32(input_size))
    angles = pos / denom                                                 # (L, D/2)
    pe = jnp.zeros((max_seq_len, input_size), dtype=jnp.float32)
    pe = pe.at[:, 0::2].set(jnp.sin(angles))
    pe = pe.at[:, 1::2].set(jnp.cos(angles))
    return pe[None].astype(dtype)                                        # (1, L, D)


# ----------------------------------------------------------------------------
# Kernel: elementwise add, pe broadcast over the leading (batch) block axis.
# Works for both the 2-D flattened blocks and the 3-D blocks.
# Accumulates in f32 (no-op for f32 inputs; preserves pe precision if x=bf16).
# ----------------------------------------------------------------------------
def _add_pe_kernel(x_ref, pe_ref, o_ref):
    o_ref[...] = (x_ref[...].astype(jnp.float32)
                  + pe_ref[...].astype(jnp.float32)).astype(o_ref.dtype)


# ----------------------------------------------------------------------------
# Tiling helpers
# ----------------------------------------------------------------------------
def _budgets():
    """(vmem_limit_bytes, per-block byte budget), generation-aware."""
    try:
        cap = int(pltpu.get_tpu_info().vmem_capacity_bytes)
    except Exception:
        cap = 64 << 20                       # conservative (v7x-class) fallback
    if cap >= (96 << 20):                    # v5e / v6e: 128 MiB VMEM
        return 64 << 20, 6 << 20
    return 32 << 20, 3 << 20                 # v7x-class: 64 MiB VMEM


def _round_down(v, q):
    return max(q, (v // q) * q)


def _prefer_divisor(extent, tile, q):
    """Prefer a tile (multiple of q, >= tile//2) dividing `extent`; else keep tile."""
    if extent % tile == 0:
        return tile
    t = tile
    floor = max(q, tile // 2)
    while t >= floor:
        if extent % t == 0:
            return t
        t -= q
    return tile


_MIN_STEPS = 4                # pipeline depth target (also feeds both v7x TCs)
_MIN_BYTES_FOR_DEPTH = 1 << 20  # only enforce depth when there is enough data


# ----------------------------------------------------------------------------
# Path 1: 3-D blocks — lane- and sublane-dense (D % 128 == 0, S % 8 == 0).
# pe is passed as the FULL (1, L, D) table; index_map touches rows [0, S) only.
# ----------------------------------------------------------------------------
def _call_3d(x, pe, block_bytes, vmem_limit):
    B, S, D = x.shape
    item = jnp.dtype(x.dtype).itemsize
    pe_item = jnp.dtype(pe.dtype).itemsize

    # Lane tile: prefer the full feature dim (contiguous HBM rows).
    if 8 * D * item <= block_bytes:
        td = D
    else:
        td = _round_down(block_bytes // (8 * item), 128)
    # Batch tile: prefer the full batch (leading dim, no sublane padding).
    if B * 8 * td * item <= block_bytes:
        tb = B
    else:
        tb = max(1, block_bytes // (8 * td * item))
    # Sequence tile (sublane dim): fill the remaining budget, multiple of 8.
    ts_cap = _round_down(block_bytes // (tb * td * item), 8)
    ts = S if S <= ts_cap else ts_cap

    # Guarantee pipeline depth when there is enough data to overlap DMA/compute.
    if B * S * D * item >= _MIN_BYTES_FOR_DEPTH:
        def steps(tb_, ts_, td_):
            return pl.cdiv(B, tb_) * pl.cdiv(S, ts_) * pl.cdiv(D, td_)
        while steps(tb, ts, td) < _MIN_STEPS and ts > 8:
            ts = _round_down(ts // 2, 8)
        while steps(tb, ts, td) < _MIN_STEPS and tb > 1:
            tb = max(1, tb // 2)
    if ts < S:
        ts = _prefer_divisor(S, ts, 8)

    cost = pl.CostEstimate(flops=B * S * D, transcendentals=0,
                           bytes_accessed=2 * B * S * D * item + S * D * pe_item)
    return pl.pallas_call(
        _add_pe_kernel,
        out_shape=jax.ShapeDtypeStruct((B, S, D), x.dtype),
        grid=(pl.cdiv(B, tb), pl.cdiv(S, ts), pl.cdiv(D, td)),
        in_specs=[pl.BlockSpec((tb, ts, td), lambda b, s, d: (b, s, d)),
                  pl.BlockSpec((1, ts, td), lambda b, s, d: (0, s, d))],
        out_specs=pl.BlockSpec((tb, ts, td), lambda b, s, d: (b, s, d)),
        compiler_params=pltpu.CompilerParams(
            dimension_semantics=("parallel", "parallel", "parallel"),
            vmem_limit_bytes=vmem_limit),
        cost_estimate=cost,
    )(x, pe)


# ----------------------------------------------------------------------------
# Path 2: flattened (B, F) blocks, F multiple of 128.  pe2 is the FULL table
# flattened to (1, >=F); only its first F elements are ever indexed.
# ----------------------------------------------------------------------------
def _call_2d(x2, pe2, block_bytes, vmem_limit):
    B, F = x2.shape
    item = jnp.dtype(x2.dtype).itemsize
    pe_item = jnp.dtype(pe2.dtype).itemsize

    # Batch (sublane) tile: full B unless even 128-wide columns blow the budget.
    if B * 128 * item <= block_bytes:
        tb = B
    else:
        tb = min(B, _round_down(block_bytes // (128 * item), 8))
    # Column (lane) tile: budget with sublane padding (blocks occupy >= 8 rows
    # of VMEM, and the pe block is always 8-row padded).
    rows_eff = ((tb + 7) // 8) * 8
    tf = min(F, _round_down(block_bytes // (rows_eff * item), 128))

    # Guarantee pipeline depth when there is enough data to overlap DMA/compute.
    if B * F * item >= _MIN_BYTES_FOR_DEPTH:
        while pl.cdiv(B, tb) * pl.cdiv(F, tf) < _MIN_STEPS and tf > 128:
            tf = _round_down(tf // 2, 128)
        while pl.cdiv(B, tb) * pl.cdiv(F, tf) < _MIN_STEPS and tb > 8:
            tb = _round_down(tb // 2, 8)
    tf = _prefer_divisor(F, tf, 128)

    cost = pl.CostEstimate(flops=B * F, transcendentals=0,
                           bytes_accessed=2 * B * F * item + F * pe_item)
    return pl.pallas_call(
        _add_pe_kernel,
        out_shape=jax.ShapeDtypeStruct((B, F), x2.dtype),
        grid=(pl.cdiv(B, tb), pl.cdiv(F, tf)),
        in_specs=[pl.BlockSpec((tb, tf), lambda b, f: (b, f)),
                  pl.BlockSpec((1, tf), lambda b, f: (0, f))],
        out_specs=pl.BlockSpec((tb, tf), lambda b, f: (b, f)),
        compiler_params=pltpu.CompilerParams(
            dimension_semantics=("parallel", "parallel"),
            vmem_limit_bytes=vmem_limit),
        cost_estimate=cost,
    )(x2, pe2)


# ----------------------------------------------------------------------------
# Wrapper (forward pass of PositionalEncoder): out = x + pe[:, :S, :]
# ----------------------------------------------------------------------------
def positional_encoder(x: jnp.ndarray, pe: jnp.ndarray) -> jnp.ndarray:
    """x: (B, S, D);  pe: (1, L, D) with L >= S (any dtype).  Returns x + pe[:, :S]."""
    B, S, D = x.shape
    pe_b, L, Dp = pe.shape
    if pe_b != 1 or Dp != D:
        raise ValueError(f"pe shape {pe.shape} incompatible with x shape {x.shape}")
    if S > L:
        raise ValueError(f"sequence length {S} exceeds max_seq_len {L}")

    vmem_limit, block_bytes = _budgets()

    # Path 1: fully dense 3-D blocks; pe passed untouched (no slice, no cast).
    if D % 128 == 0 and S % 8 == 0:
        return _call_3d(x, pe, block_bytes, vmem_limit)

    # Path 2: lane-dense flattened blocks; pe passed untouched (flatten is free
    # under jit).  Note: for B < 8 the sublane axis is padded — acceptable here
    # since this path only triggers for feature dims that aren't 128-aligned.
    flat = S * D
    if flat % 128 == 0:
        out2 = _call_2d(x.reshape(B, flat), pe.reshape(1, L * D),
                        block_bytes, vmem_limit)
        return out2.reshape(B, S, D)

    # Path 3 (rare fallback): lane-pad D to a multiple of 128 so stores are
    # unmasked, then reuse the flattened path.  The pad/slice are wrapper glue.
    # TODO(synk): the pad adds one extra glue pass over x/pe[:S]; only hit when
    # S*D is not 128-aligned.
    Dpad = pl.cdiv(D, 128) * 128
    x_p = jnp.pad(x, ((0, 0), (0, 0), (0, Dpad - D)))
    pe_p = jnp.pad(pe[:, :S, :], ((0, 0), (0, 0), (0, Dpad - D)))
    out2 = _call_2d(x_p.reshape(B, S * Dpad), pe_p.reshape(1, S * Dpad),
                    block_bytes, vmem_limit)
    return out2.reshape(B, S, Dpad)[:, :, :D]


# ----------------------------------------------------------------------------
# Demo / correctness check
# ----------------------------------------------------------------------------
if __name__ == "__main__":
    root = jax.random.PRNGKey(0)
    k1, k2, k3 = jax.random.split(root, 3)
    pe_add = jax.jit(positional_encoder)

    # Case 1 (module defaults-style shape): flattened lane-dense path.
    B, S, D = 2, 8, 32
    pe = build_pe(500, D)
    x = jax.random.normal(k1, (B, S, D), dtype=jnp.float32)
    out = jax.block_until_ready(pe_add(x, pe))
    ref = x + pe[:, :S, :]
    assert out.shape == ref.shape
    assert jnp.allclose(out, ref, atol=1e-6), "mismatch (flattened path)"

    # Case 2: 3-D lane/sublane-dense path (D % 128 == 0, S % 8 == 0).
    B2, S2, D2 = 2, 16, 128
    pe_big = build_pe(64, D2)
    x2 = jax.random.normal(k2, (B2, S2, D2), dtype=jnp.float32)
    out2 = jax.block_until_ready(pe_add(x2, pe_big))
    ref2 = x2 + pe_big[:, :S2, :]
    assert jnp.allclose(out2, ref2, atol=1e-6), "mismatch (3-D path)"

    # Case 3: fallback path (S*D not a multiple of 128).
    B3, S3, D3 = 2, 5, 6
    pe_small = build_pe(32, D3)
    x3 = jax.random.normal(k3, (B3, S3, D3), dtype=jnp.float32)
    out3 = jax.block_until_ready(pe_add(x3, pe_small))
    ref3 = x3 + pe_small[:, :S3, :]
    assert jnp.allclose(out3, ref3, atol=1e-6), "mismatch (fallback path)"

    print("KERNEL_OK")
</pallas_src>

<mosaic_0001>
module attributes {stable_mosaic.version = 11 : i64} {
  func.func @_add_pe_kernel(%arg0: i32, %arg1: i32, %arg2: memref<2x256xf32, #tpu.memory_space<vmem>>, %arg3: memref<1x256xf32, #tpu.memory_space<vmem>>, %arg4: memref<2x256xf32, #tpu.memory_space<vmem>>) attributes {dimension_semantics = [#tpu.dimension_semantics<parallel>, #tpu.dimension_semantics<parallel>], iteration_bounds = array<i64: 1, 1>, scalar_prefetch = 0 : i64, scratch_operands = 0 : i64, tpu.core_type = #tpu.core_type<tc>, window_params = [{transform_indices = @transform_0, window_bounds = array<i64: 2, 256>}, {transform_indices = @transform_1, window_bounds = array<i64: 1, 256>}, {transform_indices = @transform_2, window_bounds = array<i64: 2, 256>}]} {
    %c0 = arith.constant 0 : index
    %c0_0 = arith.constant 0 : index
    %0 = vector.load %arg2[%c0, %c0_0] : memref<2x256xf32, #tpu.memory_space<vmem>>, vector<2x256xf32>
    %c0_1 = arith.constant 0 : index
    %c0_2 = arith.constant 0 : index
    %1 = vector.load %arg3[%c0_1, %c0_2] : memref<1x256xf32, #tpu.memory_space<vmem>>, vector<1x256xf32>
    %2 = vector.broadcast %1 : vector<1x256xf32> to vector<2x256xf32>
    %3 = arith.addf %0, %2 : vector<2x256xf32>
    %c0_3 = arith.constant 0 : index
    %c0_4 = arith.constant 0 : index
    %4 = vector.load %arg4[%c0_3, %c0_4] : memref<2x256xf32, #tpu.memory_space<vmem>>, vector<2x256xf32>
    tpu.vector_store %arg4[%c0_3, %c0_4], %3 {strides = array<i32>} : memref<2x256xf32, #tpu.memory_space<vmem>>, vector<2x256xf32>,
    return
  }
  func.func @transform_0(%arg0: i32, %arg1: i32) -> (i32, i32) {
    %c0_i32 = arith.constant 0 : i32
    return %arg0, %arg1 : i32, i32
  }
  func.func @transform_1(%arg0: i32, %arg1: i32) -> (i32, i32) {
    %c0_i32 = arith.constant 0 : i32
    %c0_i32_0 = arith.constant 0 : i32
    return %c0_i32, %arg1 : i32, i32
  }
  func.func @transform_2(%arg0: i32, %arg1: i32) -> (i32, i32) {
    %c0_i32 = arith.constant 0 : i32
    return %arg0, %arg1 : i32, i32
  }
}

</mosaic_0001>

<bundles_post_ra>
// kernel: positional_encoder.1
= control target key start
LH: loop header
LB: loop body
LE: loop exit
PB: predicated region body
PF: predicated region fallthrough
CT: control target
= control target key end

     0   :  { %vm17_vm0 = vcmask 1041408   ;;  %s50_s1 = inlined_call_operand.vmem [shape: f32[1,16000], index: 1, kind: input, shape index: {}]   ;;  %s51_s0 = inlined_call_operand.vmem [shape: f32[2,256], index: 0, kind: input, shape index: {}]   ;;  %s52_s2 = inlined_call_operand.vmem [shape: f32[2,256], index: 2, kind: output, shape index: {}]  }
   0x1   :  { %v12_v0 = vld [vmem:[%s50_s1] sm:$0x3] }
   0x2   :  { %v14_v1 = vperm.slane %v12_v0, 0  ;;  %v15_v2 = vperm.slane %v12_v0, 1  ;;  %v11_v3 = vld [vmem:[%s51_s0] sm:$0xf] }
   0x4   :  { %v16_v4 = vrot.slane %v15_v2, 6 }
   0x6   :  { %v18_v5 = vsel %vm17_vm0, %v14_v1, %v16_v4 }
   0x7   :  { %v20_v6 = vadd.f32 %v18_v5, %v11_v3 }
   0x9   :  { %21 = vst [vmem:[%s52_s2] sm:$0xf] %v20_v6 }

</bundles_post_ra>
